<compile_context>
chip_gen: v7x
topology: tpu7x:2x2x1
jax: 0.10.0
libtpu: 0.0.40
codegen_flags: <defaults>
</compile_context>

<pallas_src>
import numpy as np
import jax
import jax.numpy as jnp
from jax.experimental import pallas as pl
from jax.experimental.pallas import tpu as pltpu

_LANE = 128


def _make_kernel(P, batch_tile, n_shared, n_dense, compute_dtype, fuse_concat):
    """Kernel body for one batch tile; players folded into the matmul M dim."""

    def kernel(*refs):
        # ref order: x, (Ws, bs) * n_shared, (Wd, bd) * n_dense, out
        x_ref = refs[0]
        pos = 1
        shared = [(refs[pos + 2 * i], refs[pos + 2 * i + 1]) for i in range(n_shared)]
        pos += 2 * n_shared
        dense = [(refs[pos + 2 * i], refs[pos + 2 * i + 1]) for i in range(n_dense)]
        pos += 2 * n_dense
        out_ref = refs[pos]

        Bt = batch_tile
        F = x_ref.shape[-1]

        # ---- shared MLP: all P players stacked along the MXU M dimension ----
        # Cast in-register; x stays in its native dtype in HBM/VMEM.
        h = x_ref[...].reshape(P * Bt, F).astype(compute_dtype)
        for w_ref, b_ref in shared:
            a = jnp.dot(h, w_ref[...], preferred_element_type=jnp.float32)
            # bias-add + relu in f32 (v5e VPU has no bf16); only the MXU sees
            # compute_dtype operands.
            h = jnp.maximum(a + b_ref[...], 0.0).astype(compute_dtype)

        s_last = h.shape[-1]
        w0_ref, b0_ref = dense[0]  # (P * s_last, D1), (1, D1)

        if fuse_concat:
            # concat over players as ONE K = P*s_last matmul: the relayout
            # (P*Bt, S) -> (Bt, P*S) rides the XLU; accumulation over players
            # then happens inside the MXU instead of as VPU f32 adds.
            hc = jnp.transpose(h.reshape(P, Bt, s_last), (1, 0, 2))
            hc = hc.reshape(Bt, P * s_last)
            z = jnp.dot(hc, w0_ref[...], preferred_element_type=jnp.float32)
        else:
            # Fallback: concat(h_0..h_{P-1}) @ W == sum_p h_p @ W[p*S:(p+1)*S]
            z = jnp.dot(h[0:Bt, :], w0_ref[0:s_last, :],
                        preferred_element_type=jnp.float32)
            for p in range(1, P):
                z = z + jnp.dot(h[p * Bt:(p + 1) * Bt, :],
                                w0_ref[p * s_last:(p + 1) * s_last, :],
                                preferred_element_type=jnp.float32)
        z = z + b0_ref[...]
        if n_dense > 1:  # relu after every dense layer except the last
            z = jnp.maximum(z, 0.0)

        # ---- remaining dense layers ----
        for j in range(1, n_dense):
            w_ref, b_ref = dense[j]
            z = jnp.dot(z.astype(compute_dtype), w_ref[...],
                        preferred_element_type=jnp.float32) + b_ref[...]
            if j < n_dense - 1:
                z = jnp.maximum(z, 0.0)

        out_ref[...] = z.astype(out_ref.dtype)

    return kernel


def prepare_params(shared_params, dense_params, *, compute_dtype=jnp.bfloat16):
    """One-time parameter prep (do NOT repeat per call): cast weights to the MXU
    operand dtype, keep biases f32, zero-pad the output layer to a lane-dense
    (multiple-of-128) width so the kernel's output store is an unmasked vst."""
    cdt = jnp.dtype(compute_dtype)
    num_labels = int(dense_params[-1][0].shape[1])
    nl_pad = -(-num_labels // _LANE) * _LANE

    shared_p = [(jnp.asarray(w).astype(cdt),
                 jnp.asarray(b, jnp.float32).reshape(1, -1))
                for w, b in shared_params]
    dense_p = []
    n_dense = len(dense_params)
    for i, (w, b) in enumerate(dense_params):
        w = jnp.asarray(w, jnp.float32)
        b = jnp.asarray(b, jnp.float32).reshape(1, -1)
        if i == n_dense - 1 and nl_pad != num_labels:
            w = jnp.pad(w, ((0, 0), (0, nl_pad - num_labels)))
            b = jnp.pad(b, ((0, 0), (0, nl_pad - num_labels)))
        dense_p.append((w.astype(cdt), b))
    return dict(shared=shared_p, dense=dense_p, num_labels=num_labels,
                nl_pad=nl_pad, compute_dtype=cdt)


def _vmem_budget_bytes():
    """<= ~85% of per-core VMEM (~54 MiB on v7x's 64 MiB, ~108 MiB on v5e/v6e)."""
    try:
        cap = int(pltpu.get_tpu_info().vmem_capacity_bytes)
    except Exception:
        cap = 64 * 1024 * 1024  # conservative fallback = v7x per-core capacity
    return min(int(cap * 0.85), cap - 8 * 1024 * 1024)


def _choose_batch_tile(B, sublane, fits, max_tile=2048):
    """Largest divisor-of-B tile (multiple of the sublane pack, <= max_tile)
    that fits the VMEM plan, preferring >= 2 grid steps (v7x megacore sharding
    + x/out DMA pipelining) over a single full-batch step."""
    divs = [d for d in range(sublane, min(B, max_tile) + 1, sublane) if B % d == 0]
    divs.sort(reverse=True)
    single_step = None
    for d in divs:
        if not fits(d):
            continue
        if B // d >= 2:
            return d
        if single_step is None:
            single_step = d
    if single_step is not None:
        return single_step
    # TODO(synk): if params alone overflow VMEM, stream the largest dense
    # weight over a K-tiled grid axis instead of keeping it resident.
    return divs[-1] if divs else B


def shared_weights_csgo_forward(x, prepared, *, batch_tile=None, fuse_concat=True):
    """x: [P, B, F] (f32 or bf16). `prepared` comes from prepare_params()."""
    shared_p = prepared["shared"]
    dense_p = prepared["dense"]
    num_labels = prepared["num_labels"]
    nl_pad = prepared["nl_pad"]
    cdt = prepared["compute_dtype"]

    P, B, F = x.shape
    n_shared = len(shared_p)
    n_dense = len(dense_p)
    s_last = shared_p[-1][0].shape[1] if n_shared else F
    assert dense_p[0][0].shape[0] == P * s_last

    # Sublane pack of the narrowest dtype touched by in-kernel reshapes.
    x_itemsize = jnp.dtype(x.dtype).itemsize
    sublane = max(8, 32 // min(x_itemsize, cdt.itemsize))

    # Pad the batch so (a) tiles are sublane-aligned and (b) >= 2 grid steps
    # are possible (v7x has 2 TensorCores; a 1-step grid idles one of them).
    step = 2 * sublane if B > sublane else sublane
    B_pad = -(-B // step) * step
    if B_pad != B:
        x = jnp.pad(x, ((0, 0), (0, B_pad - B), (0, 0)))

    # ---- VMEM plan ----
    params_flat = [a for pair in (shared_p + dense_p) for a in pair]
    param_bytes = sum(int(np.prod(a.shape)) * jnp.dtype(a.dtype).itemsize
                      for a in params_flat)
    shared_widths = [F] + [w.shape[1] for w, _ in shared_p]
    dense_widths = [w.shape[1] for w, _ in dense_p]
    max_act_cols = max([P * w for w in shared_widths] + dense_widths + [nl_pad])

    def vmem_needed(bt):
        x_tile = P * bt * F * x_itemsize
        out_tile = bt * nl_pad * 4
        act = 3 * bt * max_act_cols * 4  # a few f32-sized live temporaries
        return param_bytes + 2 * (x_tile + out_tile) + act

    budget = _vmem_budget_bytes()
    if batch_tile is None:
        batch_tile = _choose_batch_tile(B_pad, sublane,
                                        lambda bt: vmem_needed(bt) <= budget)
    assert B_pad % batch_tile == 0
    nbt = B_pad // batch_tile
    vmem_limit = int(min(max(vmem_needed(batch_tile), 32 * 1024 * 1024), budget))

    # ---- specs: only x / out are pipelined; params are single-copy VMEM residents ----
    resident = pl.BlockSpec(memory_space=pltpu.MemorySpace.VMEM)
    in_specs = [pl.BlockSpec((P, batch_tile, F), lambda i: (0, i, 0))]
    in_specs += [resident] * (2 * (n_shared + n_dense))
    out_spec = pl.BlockSpec((batch_tile, nl_pad), lambda i: (i, 0))

    inputs = [x]
    for w, b in shared_p + dense_p:
        inputs += [w, b]

    flops = (2 * P * B_pad * sum(w.shape[0] * w.shape[1] for w, _ in shared_p)
             + 2 * B_pad * sum(w.shape[0] * w.shape[1] for w, _ in dense_p))
    bytes_accessed = P * B_pad * F * x_itemsize + param_bytes + B_pad * nl_pad * 4

    kernel = _make_kernel(P, batch_tile, n_shared, n_dense, cdt, fuse_concat)

    out = pl.pallas_call(
        kernel,
        out_shape=jax.ShapeDtypeStruct((B_pad, nl_pad), jnp.float32),
        grid_spec=pltpu.PrefetchScalarGridSpec(
            num_scalar_prefetch=0,
            grid=(nbt,),
            in_specs=in_specs,
            out_specs=out_spec,
        ),
        compiler_params=pltpu.CompilerParams(
            dimension_semantics=("parallel",),
            vmem_limit_bytes=vmem_limit,
        ),
        cost_estimate=pl.CostEstimate(
            flops=int(flops), transcendentals=0,
            bytes_accessed=int(bytes_accessed)),
    )(*inputs)

    return out[:B, :num_labels]


def ref_forward_np(x, shared_params, dense_params):
    """Ground-truth reference in NumPy float64, mirroring the PyTorch forward."""
    x = np.asarray(x, np.float64)
    sp = [(np.asarray(w, np.float64), np.asarray(b, np.float64).reshape(1, -1))
          for w, b in shared_params]
    dp = [(np.asarray(w, np.float64), np.asarray(b, np.float64).reshape(1, -1))
          for w, b in dense_params]
    outs = []
    for p in range(x.shape[0]):
        h = x[p]
        for w, b in sp:
            h = np.maximum(h @ w + b, 0.0)
        outs.append(h)
    z = np.concatenate(outs, axis=1)
    for i, (w, b) in enumerate(dp):
        z = z @ w + b
        if i < len(dp) - 1:
            z = np.maximum(z, 0.0)
    return z


def init_params(key, num_players, feat_per_player, shared_layer_sizes,
                dense_layer_sizes, num_labels):
    """Deterministic synthetic init (W stored as [in, out], b as [1, out])."""
    shared_params, dense_params = [], []
    prev = feat_per_player
    for size in shared_layer_sizes:
        key, kw, kb = jax.random.split(key, 3)
        w = jax.random.normal(kw, (prev, size), jnp.float32) / np.sqrt(prev)
        b = 0.1 * jax.random.normal(kb, (1, size), jnp.float32)
        shared_params.append((w, b))
        prev = size
    prev = num_players * prev
    for size in list(dense_layer_sizes) + [num_labels]:
        key, kw, kb = jax.random.split(key, 3)
        w = jax.random.normal(kw, (prev, size), jnp.float32) / np.sqrt(prev)
        b = 0.1 * jax.random.normal(kb, (1, size), jnp.float32)
        dense_params.append((w, b))
        prev = size
    return shared_params, dense_params


if __name__ == "__main__":
    # Small shapes consistent with the module structure.
    num_players = 4
    feat_per_player = 16           # num_all_player_features = 64
    batch = 32                     # -> two parallel grid steps of 16 rows
    shared_layer_sizes = [32, 16]
    dense_layer_sizes = [32, 16]
    num_labels = 8

    key = jax.random.PRNGKey(0)
    key, kx = jax.random.split(key)
    x = jax.random.normal(kx, (num_players, batch, feat_per_player), jnp.float32)

    shared_params, dense_params = init_params(
        key, num_players, feat_per_player, shared_layer_sizes,
        dense_layer_sizes, num_labels)

    ref = ref_forward_np(x, shared_params, dense_params)

    # f32 MXU operands. Tolerance covers whatever f32-pass scheme the MXU uses.
    prep_f32 = prepare_params(shared_params, dense_params,
                              compute_dtype=jnp.float32)
    out_f32 = jax.block_until_ready(shared_weights_csgo_forward(x, prep_f32))
    np.testing.assert_allclose(np.asarray(out_f32, np.float64), ref,
                               rtol=1e-2, atol=1e-2)

    # Fallback (sum-of-P-dots) concat path, same f32 params.
    out_fb = jax.block_until_ready(
        shared_weights_csgo_forward(x, prep_f32, fuse_concat=False))
    np.testing.assert_allclose(np.asarray(out_fb, np.float64), ref,
                               rtol=1e-2, atol=1e-2)

    # bf16 MXU operands (default; native fast path on v5e/v6e/v7x), f32 accum.
    prep_bf16 = prepare_params(shared_params, dense_params,
                               compute_dtype=jnp.bfloat16)
    out_bf16 = jax.block_until_ready(shared_weights_csgo_forward(x, prep_bf16))
    np.testing.assert_allclose(np.asarray(out_bf16, np.float64), ref,
                               rtol=1e-1, atol=1e-1)

    print("KERNEL_OK")
</pallas_src>

<mosaic_0001>
module attributes {stable_mosaic.version = 11 : i64} {
  func.func @kernel(%arg0: i32, %arg1: memref<4x16x16xf32, #tpu.memory_space<vmem>>, %arg2: memref<16x32xf32, #tpu.memory_space<vmem>>, %arg3: memref<1x32xf32, #tpu.memory_space<vmem>>, %arg4: memref<32x16xf32, #tpu.memory_space<vmem>>, %arg5: memref<1x16xf32, #tpu.memory_space<vmem>>, %arg6: memref<64x32xf32, #tpu.memory_space<vmem>>, %arg7: memref<1x32xf32, #tpu.memory_space<vmem>>, %arg8: memref<32x16xf32, #tpu.memory_space<vmem>>, %arg9: memref<1x16xf32, #tpu.memory_space<vmem>>, %arg10: memref<16x128xf32, #tpu.memory_space<vmem>>, %arg11: memref<1x128xf32, #tpu.memory_space<vmem>>, %arg12: memref<16x128xf32, #tpu.memory_space<vmem>>) attributes {dimension_semantics = [#tpu.dimension_semantics<parallel>], iteration_bounds = array<i64: 2>, scalar_prefetch = 0 : i64, scratch_operands = 0 : i64, tpu.core_type = #tpu.core_type<tc>, window_params = [{transform_indices = @transform_0, window_bounds = array<i64: 4, 16, 16>}, {pipeline_mode = #tpu.pipeline_mode<synchronous>, transform_indices = @transform_1, window_bounds = array<i64: 16, 32>}, {pipeline_mode = #tpu.pipeline_mode<synchronous>, transform_indices = @transform_2, window_bounds = array<i64: 1, 32>}, {pipeline_mode = #tpu.pipeline_mode<synchronous>, transform_indices = @transform_3, window_bounds = array<i64: 32, 16>}, {pipeline_mode = #tpu.pipeline_mode<synchronous>, transform_indices = @transform_4, window_bounds = array<i64: 1, 16>}, {pipeline_mode = #tpu.pipeline_mode<synchronous>, transform_indices = @transform_5, window_bounds = array<i64: 64, 32>}, {pipeline_mode = #tpu.pipeline_mode<synchronous>, transform_indices = @transform_6, window_bounds = array<i64: 1, 32>}, {pipeline_mode = #tpu.pipeline_mode<synchronous>, transform_indices = @transform_7, window_bounds = array<i64: 32, 16>}, {pipeline_mode = #tpu.pipeline_mode<synchronous>, transform_indices = @transform_8, window_bounds = array<i64: 1, 16>}, {pipeline_mode = #tpu.pipeline_mode<synchronous>, transform_indices = @transform_9, window_bounds = array<i64: 16, 128>}, {pipeline_mode = #tpu.pipeline_mode<synchronous>, transform_indices = @transform_10, window_bounds = array<i64: 1, 128>}, {transform_indices = @transform_11, window_bounds = array<i64: 16, 128>}]} {
    %c0 = arith.constant 0 : index
    %c0_0 = arith.constant 0 : index
    %c0_1 = arith.constant 0 : index
    %0 = vector.load %arg1[%c0, %c0_0, %c0_1] : memref<4x16x16xf32, #tpu.memory_space<vmem>>, vector<4x16x16xf32>
    %1 = vector.shape_cast %0 : vector<4x16x16xf32> to vector<64x16xf32>
    %c0_2 = arith.constant 0 : index
    %c0_3 = arith.constant 0 : index
    %2 = vector.load %arg2[%c0_2, %c0_3] : memref<16x32xf32, #tpu.memory_space<vmem>>, vector<16x32xf32>
    %cst = arith.constant dense<0.000000e+00> : vector<64x32xf32>
    %3 = tpu.matmul %1, %2, %cst {dimension_numbers = #tpu.dot_dimension_numbers<[1], [0], [0], [1], [0, 0, 1, 1], [], []>} : vector<64x16xf32>, vector<16x32xf32>, vector<64x32xf32> -> vector<64x32xf32>
    %c0_4 = arith.constant 0 : index
    %c0_5 = arith.constant 0 : index
    %4 = vector.load %arg3[%c0_4, %c0_5] : memref<1x32xf32, #tpu.memory_space<vmem>>, vector<1x32xf32>
    %5 = vector.broadcast %4 : vector<1x32xf32> to vector<64x32xf32>
    %6 = arith.addf %3, %5 : vector<64x32xf32>
    %cst_6 = arith.constant 0.000000e+00 : f32
    %7 = vector.broadcast %cst_6 : f32 to vector<64x32xf32>
    %8 = arith.maximumf %6, %7 : vector<64x32xf32>
    %c0_7 = arith.constant 0 : index
    %c0_8 = arith.constant 0 : index
    %9 = vector.load %arg4[%c0_7, %c0_8] : memref<32x16xf32, #tpu.memory_space<vmem>>, vector<32x16xf32>
    %cst_9 = arith.constant dense<0.000000e+00> : vector<64x16xf32>
    %10 = tpu.matmul %8, %9, %cst_9 {dimension_numbers = #tpu.dot_dimension_numbers<[1], [0], [0], [1], [0, 0, 1, 1], [], []>} : vector<64x32xf32>, vector<32x16xf32>, vector<64x16xf32> -> vector<64x16xf32>
    %c0_10 = arith.constant 0 : index
    %c0_11 = arith.constant 0 : index
    %11 = vector.load %arg5[%c0_10, %c0_11] : memref<1x16xf32, #tpu.memory_space<vmem>>, vector<1x16xf32>
    %12 = vector.broadcast %11 : vector<1x16xf32> to vector<64x16xf32>
    %13 = arith.addf %10, %12 : vector<64x16xf32>
    %cst_12 = arith.constant 0.000000e+00 : f32
    %14 = vector.broadcast %cst_12 : f32 to vector<64x16xf32>
    %15 = arith.maximumf %13, %14 : vector<64x16xf32>
    %16 = vector.shape_cast %15 : vector<64x16xf32> to vector<4x16x16xf32>
    %17 = tpu.transpose %16, [1, 0, 2] : vector<4x16x16xf32> -> vector<16x4x16xf32>
    %18 = vector.shape_cast %17 : vector<16x4x16xf32> to vector<16x64xf32>
    %c0_13 = arith.constant 0 : index
    %c0_14 = arith.constant 0 : index
    %19 = vector.load %arg6[%c0_13, %c0_14] : memref<64x32xf32, #tpu.memory_space<vmem>>, vector<64x32xf32>
    %cst_15 = arith.constant dense<0.000000e+00> : vector<16x32xf32>
    %20 = tpu.matmul %18, %19, %cst_15 {dimension_numbers = #tpu.dot_dimension_numbers<[1], [0], [0], [1], [0, 0, 1, 1], [], []>} : vector<16x64xf32>, vector<64x32xf32>, vector<16x32xf32> -> vector<16x32xf32>
    %c0_16 = arith.constant 0 : index
    %c0_17 = arith.constant 0 : index
    %21 = vector.load %arg7[%c0_16, %c0_17] : memref<1x32xf32, #tpu.memory_space<vmem>>, vector<1x32xf32>
    %22 = vector.broadcast %21 : vector<1x32xf32> to vector<16x32xf32>
    %23 = arith.addf %20, %22 : vector<16x32xf32>
    %cst_18 = arith.constant 0.000000e+00 : f32
    %24 = vector.broadcast %cst_18 : f32 to vector<16x32xf32>
    %25 = arith.maximumf %23, %24 : vector<16x32xf32>
    %c0_19 = arith.constant 0 : index
    %c0_20 = arith.constant 0 : index
    %26 = vector.load %arg8[%c0_19, %c0_20] : memref<32x16xf32, #tpu.memory_space<vmem>>, vector<32x16xf32>
    %cst_21 = arith.constant dense<0.000000e+00> : vector<16x16xf32>
    %27 = tpu.matmul %25, %26, %cst_21 {dimension_numbers = #tpu.dot_dimension_numbers<[1], [0], [0], [1], [0, 0, 1, 1], [], []>} : vector<16x32xf32>, vector<32x16xf32>, vector<16x16xf32> -> vector<16x16xf32>
    %c0_22 = arith.constant 0 : index
    %c0_23 = arith.constant 0 : index
    %28 = vector.load %arg9[%c0_22, %c0_23] : memref<1x16xf32, #tpu.memory_space<vmem>>, vector<1x16xf32>
    %29 = vector.broadcast %28 : vector<1x16xf32> to vector<16x16xf32>
    %30 = arith.addf %27, %29 : vector<16x16xf32>
    %cst_24 = arith.constant 0.000000e+00 : f32
    %31 = vector.broadcast %cst_24 : f32 to vector<16x16xf32>
    %32 = arith.maximumf %30, %31 : vector<16x16xf32>
    %c0_25 = arith.constant 0 : index
    %c0_26 = arith.constant 0 : index
    %33 = vector.load %arg10[%c0_25, %c0_26] : memref<16x128xf32, #tpu.memory_space<vmem>>, vector<16x128xf32>
    %cst_27 = arith.constant dense<0.000000e+00> : vector<16x128xf32>
    %34 = tpu.matmul %32, %33, %cst_27 {dimension_numbers = #tpu.dot_dimension_numbers<[1], [0], [0], [1], [0, 0, 1, 1], [], []>} : vector<16x16xf32>, vector<16x128xf32>, vector<16x128xf32> -> vector<16x128xf32>
    %c0_28 = arith.constant 0 : index
    %c0_29 = arith.constant 0 : index
    %35 = vector.load %arg11[%c0_28, %c0_29] : memref<1x128xf32, #tpu.memory_space<vmem>>, vector<1x128xf32>
    %36 = vector.broadcast %35 : vector<1x128xf32> to vector<16x128xf32>
    %37 = arith.addf %34, %36 : vector<16x128xf32>
    %c0_30 = arith.constant 0 : index
    %c0_31 = arith.constant 0 : index
    %38 = vector.load %arg12[%c0_30, %c0_31] : memref<16x128xf32, #tpu.memory_space<vmem>>, vector<16x128xf32>
    tpu.vector_store %arg12[%c0_30, %c0_31], %37 {strides = array<i32>} : memref<16x128xf32, #tpu.memory_space<vmem>>, vector<16x128xf32>,
    return
  }
  func.func @transform_0(%arg0: i32) -> (i32, i32, i32) {
    %c0_i32 = arith.constant 0 : i32
    %c0_i32_0 = arith.constant 0 : i32
    %c0_i32_1 = arith.constant 0 : i32
    return %c0_i32, %arg0, %c0_i32_0 : i32, i32, i32
  }
  func.func @transform_1(%arg0: i32) -> (i32, i32) {
    %c0_i32 = arith.constant 0 : i32
    %c0_i32_0 = arith.constant 0 : i32
    %c0_i32_1 = arith.constant 0 : i32
    return %c0_i32, %c0_i32_0 : i32, i32
  }
  func.func @transform_2(%arg0: i32) -> (i32, i32) {
    %c0_i32 = arith.constant 0 : i32
    %c0_i32_0 = arith.constant 0 : i32
    %c0_i32_1 = arith.constant 0 : i32
    return %c0_i32, %c0_i32_0 : i32, i32
  }
  func.func @transform_3(%arg0: i32) -> (i32, i32) {
    %c0_i32 = arith.constant 0 : i32
    %c0_i32_0 = arith.constant 0 : i32
    %c0_i32_1 = arith.constant 0 : i32
    return %c0_i32, %c0_i32_0 : i32, i32
  }
  func.func @transform_4(%arg0: i32) -> (i32, i32) {
    %c0_i32 = arith.constant 0 : i32
    %c0_i32_0 = arith.constant 0 : i32
    %c0_i32_1 = arith.constant 0 : i32
    return %c0_i32, %c0_i32_0 : i32, i32
  }
  func.func @transform_5(%arg0: i32) -> (i32, i32) {
    %c0_i32 = arith.constant 0 : i32
    %c0_i32_0 = arith.constant 0 : i32
    %c0_i32_1 = arith.constant 0 : i32
    return %c0_i32, %c0_i32_0 : i32, i32
  }
  func.func @transform_6(%arg0: i32) -> (i32, i32) {
    %c0_i32 = arith.constant 0 : i32
    %c0_i32_0 = arith.constant 0 : i32
    %c0_i32_1 = arith.constant 0 : i32
    return %c0_i32, %c0_i32_0 : i32, i32
  }
  func.func @transform_7(%arg0: i32) -> (i32, i32) {
    %c0_i32 = arith.constant 0 : i32
    %c0_i32_0 = arith.constant 0 : i32
    %c0_i32_1 = arith.constant 0 : i32
    return %c0_i32, %c0_i32_0 : i32, i32
  }
  func.func @transform_8(%arg0: i32) -> (i32, i32) {
    %c0_i32 = arith.constant 0 : i32
    %c0_i32_0 = arith.constant 0 : i32
    %c0_i32_1 = arith.constant 0 : i32
    return %c0_i32, %c0_i32_0 : i32, i32
  }
  func.func @transform_9(%arg0: i32) -> (i32, i32) {
    %c0_i32 = arith.constant 0 : i32
    %c0_i32_0 = arith.constant 0 : i32
    %c0_i32_1 = arith.constant 0 : i32
    return %c0_i32, %c0_i32_0 : i32, i32
  }
  func.func @transform_10(%arg0: i32) -> (i32, i32) {
    %c0_i32 = arith.constant 0 : i32
    %c0_i32_0 = arith.constant 0 : i32
    %c0_i32_1 = arith.constant 0 : i32
    return %c0_i32, %c0_i32_0 : i32, i32
  }
  func.func @transform_11(%arg0: i32) -> (i32, i32) {
    %c0_i32 = arith.constant 0 : i32
    %c0_i32_0 = arith.constant 0 : i32
    return %arg0, %c0_i32 : i32, i32
  }
}

</mosaic_0001>

<bundles_post_ra>
// kernel: tpu_custom_call.1
= control target key start
LH: loop header
LB: loop body
LE: loop exit
PB: predicated region body
PF: predicated region fallthrough
CT: control target
= control target key end

     0   :  { %s2015_s0 = inlined_call_operand.vmem [shape: f32[4,32,16], index: 0, kind: input, shape index: {}]   ;;  %s2016_s1 = inlined_call_operand.vmem [shape: f32[16,32], index: 1, kind: input, shape index: {}]   ;;  %s2017_s2 = inlined_call_operand.vmem [shape: f32[1,32], index: 2, kind: input, shape index: {}]   ;;  %s2018_s3 = inlined_call_operand.vmem [shape: f32[32,16], index: 3, kind: input, shape index: {}]   ;;  %s2019_s4 = inlined_call_operand.vmem [shape: f32[1,16], index: 4, kind: input, shape index: {}]   ;;  %s2020_s5 = inlined_call_operand.vmem [shape: f32[64,32], index: 5, kind: input, shape index: {}]   ;;  %s2021_s6 = inlined_call_operand.vmem [shape: f32[1,32], index: 6, kind: input, shape index: {}]   ;;  %s2022_s7 = inlined_call_operand.vmem [shape: f32[32,16], index: 7, kind: input, shape index: {}]   ;;  %s2023_s8 = inlined_call_operand.vmem [shape: f32[1,16], index: 8, kind: input, shape index: {}]   ;;  %s2024_s9 = inlined_call_operand.vmem [shape: f32[16,128], index: 9, kind: input, shape index: {}]   ;;  %s2025_s10 = inlined_call_operand.vmem [shape: f32[1,128], index: 10, kind: input, shape index: {}]   ;;  %s2026_s11 = inlined_call_operand.hbm [shape: f32[32,128], index: 11, kind: output, shape index: {}]  }
   0x1   :  { %2027 = sst [smem:[#allocation6_spill]] %s2015_s0 }
   0x2   :  { %16 = vsyncpa [#allocation4], 0 }
   0x3   :  { %18 = vsyncpa [#allocation4 + $0x1], 0  ;;  %s1804_s17 = smov 0   ;;  %s1806_s18 = smov 0  }
   0x4   :  { %s1808_s19 = smov 0   ;;  %s1810_s20 = smov 0  }
   0x5 LB: > { %s1423_s21 = sadd.s32 4294967295, %s1734_s20   ;;  %s1424_s22 = sadd.s32 4294967294, %s1734_s20   ;;  %s1734_s20 = sphi %s1810_s20, %s2034_s20   ;;  %s1730_s19 = sphi %s1808_s19, %s2033_s19   ;;  %s1726_s18 = sphi %s1806_s18, %s2032_s18   ;;  %s1722_s17 = sphi %s1804_s17, %s2031_s17  }
   0x6   : > { %s1827_s23 = sadd.s32 1, %s1734_s20   ;;  %s31_s24 = sadd.s32 1, %s1730_s19 }
   0x7   : > { %s28_s25 = ssub.s32 %s1734_s20, %s1827_s23  ;;  %p38_p0 = scmp.ne.s32.totalorder %s1730_s19, %s1726_s18 }
   0x8   : > { %p29_p1 = scmp.eq.s32.totalorder %s28_s25, 0  ;;  %p39_p2 = scmp.eq.s32.totalorder %s1734_s20, 0 }
   0x9   : > { %p278_p3 = scmp.eq.s32.totalorder %s1423_s21, 1  ;;  %p283_p4 = scmp.ne.s32.totalorder %s1726_s18, %s1722_s17 }
   0xa   : > { %s1840_s26 = scalar_select %p29_p1, %s1730_s19, %s31_s24  }
   0xb   : > { %p40_p5 = por %p39_p2, %p38_p0  ;;  %p1842_p6 = por %p278_p3, %p38_p0 }
   0xc   : > { %p284_p7 = scmp.eq.s32.totalorder %s1424_s22, 1  ;;  %p1426_p9 = scmp.ge.s32.totalorder %s1734_s20, 2 }
   0xe   : > { %p1846_p8 = por %p284_p7, %p283_p4  ;;  %330 = sbr.rel (%p1426_p9) target bundleno = 35 (0x23), region = 56 }
  0x15   : > { %333 = sbr.rel (!%p40_p5) target bundleno = 35 (0x23), region = 60  ;;  %s335_s29 = sand.u32 (%p40_p5), 1, %s1730_s19  }
  0x16   : > { %s1469_s30 = sshll.u32 (%p40_p5), %s1734_s20, 4  ;;  %s1427_s12 = sshll.u32 (%p40_p5), %s335_s29, 6 }
  0x17   : > { %s2030_s0 = sld [smem:[#allocation6_spill]] (%p40_p5)  ;;  %s337_s16 = scalar_lea.vmem (%p40_p5), [#allocation2], %s1427_s12 }
  0x1d   : > { %s340_s15 = scalar_lea.vmem %s2030_s0, %s1469_s30 }
  0x1e   : > { %v382_v0 = vld [vmem:[%s340_s15] sm:$0xff]  ;;  %v384_v1 = vld [vmem:[%s340_s15 + $0x8] sm:$0xff] }
  0x1f   : > { %v386_v2 = vld [vmem:[%s340_s15 + $0x20] sm:$0xff]  ;;  %383 = vst [vmem:[%s337_s16] sm:$0xff] %v382_v0  ;;  %385 = vst [vmem:[%s337_s16 + $0x8] sm:$0xff] %v384_v1  ;;  %v388_v3 = vld [vmem:[%s340_s15 + $0x28] sm:$0xff] }
  0x20   : > { %387 = vst [vmem:[%s337_s16 + $0x10] sm:$0xff] %v386_v2  ;;  %v390_v4 = vld [vmem:[%s340_s15 + $0x40] sm:$0xff]  ;;  %v392_v5 = vld [vmem:[%s340_s15 + $0x48] sm:$0xff]  ;;  %389 = vst [vmem:[%s337_s16 + $0x18] sm:$0xff] %v388_v3 }
  0x21   : > { %391 = vst [vmem:[%s337_s16 + $0x20] sm:$0xff] %v390_v4  ;;  %393 = vst [vmem:[%s337_s16 + $0x28] sm:$0xff] %v392_v5  ;;  %v394_v6 = vld [vmem:[%s340_s15 + $0x60] sm:$0xff]  ;;  %v396_v7 = vld [vmem:[%s340_s15 + $0x68] sm:$0xff] }
  0x22   : > { %395 = vst [vmem:[%s337_s16 + $0x30] sm:$0xff] %v394_v6  ;;  %397 = vst [vmem:[%s337_s16 + $0x38] sm:$0xff] %v396_v7 }
  0x23 PF: > { %p1430_p10 = scmp.ge.s32.totalorder %s1734_s20, 1  ;;  %p402_p11 = scmp.lt.s32.totalorder %s1734_s20, 3 }
  0x25   : > { %p403_p12 = pnand %p1430_p10, %p402_p11 }
  0x26   : > { %v458_v8 = vld [vmem:[%s2016_s1] sm:$0xff] (!%p403_p12)  ;;  %v459_v9 = vld [vmem:[%s2016_s1 + $0x8] sm:$0xff] (!%p403_p12)  ;;  %s1867_s30 = sand.u32 (!%p403_p12), 1, %s1726_s18   ;;  %vm467_vm0 = vcmask (!%p403_p12), 130048   ;;  %v607_v22 = vld [vmem:[%s2018_s3 + $0x10] sm:$0xff] (!%p403_p12)  ;;  %vm616_vm1 = vcmask (!%p403_p12), 261120   ;;  %v759_v0 = vlaneseq (!%p403_p12) }
  0x27   : > { %406 = sbr.rel (%p403_p12) target bundleno = 1300 (0x514), region = 98  ;;  %v605_v10 = vld [vmem:[%s2018_s3] sm:$0xff] (!%p403_p12)  ;;  %v1586_v11 = vpack.c.bf16 (!%p403_p12), %v459_v9, %v458_v8  ;;  %s1431_s14 = sshll.u32 (!%p403_p12), %s1867_s30, 6  ;;  %v606_v12 = vld [vmem:[%s2018_s3 + $0x8] sm:$0xff] (!%p403_p12)  ;;  %v608_v23 = vld [vmem:[%s2018_s3 + $0x18] sm:$0xff] (!%p403_p12)  ;;  %vm1054_vm2 = vcmask (!%p403_p12), 392192  }
  0x28   : > { %v1590_v13 = vpack.c.bf16 (!%p403_p12), %v606_v12, %v605_v10  ;;  %s411_s22 = scalar_lea.vmem (!%p403_p12), [#allocation2], %s1431_s14  ;;  %v1594_v24 = vpack.c.bf16 (!%p403_p12), %v608_v23, %v607_v22  ;;  %v1433_v25 = vld [vmem:[%s2017_s2] ss:$0 sm:$0xff] (!%p403_p12)  ;;  %v1058_v51 = vld [vmem:[%s2020_s5 + $0x8] sm:$0xff] (!%p403_p12)  ;;  %v1059_v52 = vld [vmem:[%s2020_s5 + $0x10] sm:$0xff] (!%p403_p12)  ;;  %v760_v12 = vshrl.u32 (!%p403_p12), %v759_v0, 7 }
  0x29   : > { %1587 = vmatprep.subr.bf16.mxu0 (!%p403_p12), %v1586_v11  ;;  %v450_v14 = vld [vmem:[%s411_s22] sm:$0xff] (!%p403_p12)  ;;  %v451_v15 = vld [vmem:[%s411_s22 + $0x8] sm:$0xff] (!%p403_p12)  ;;  %v452_v16 = vld [vmem:[%s411_s22 + $0x10] sm:$0xff] (!%p403_p12)  ;;  %v1736_v61 = vmov (!%p403_p12), 1983009808   ;;  %s1738_s14 = smov (!%p403_p12), 32  }
  0x2a   : > { %1589 = vmatpush3.bf16.msra.mxu0 (!%p403_p12), %v1586_v11  ;;  %1517 = vmatprep.mubr.msk.f32.mxu0 (!%p403_p12), %vm467_vm0, %v450_v14  ;;  %v453_v17 = vld [vmem:[%s411_s22 + $0x18] sm:$0xff] (!%p403_p12)  ;;  %v454_v18 = vld [vmem:[%s411_s22 + $0x20] sm:$0xff] (!%p403_p12)  ;;  %v455_v19 = vld [vmem:[%s411_s22 + $0x28] sm:$0xff] (!%p403_p12)  ;;  %v757_v62 = vunpack.c.l.s4 (!%p403_p12), %v1736_v61  ;;  %v1737_v7 = vmov (!%p403_p12), 1934713408   ;;  %s1739_s15 = smov (!%p403_p12), 16  }
  0x2b   : > { %1591 = vmatprep.subr.bf16.mxu1 (!%p403_p12), %v1590_v13  ;;  %v456_v20 = vld [vmem:[%s411_s22 + $0x30] sm:$0xff] (!%p403_p12)  ;;  %v457_v21 = vld [vmem:[%s411_s22 + $0x38] sm:$0xff] (!%p403_p12)  ;;  %v1057_v50 = vld [vmem:[%s2020_s5] sm:$0xff] (!%p403_p12)  ;;  %v789_v8 = vunpack.c.l.s4 (!%p403_p12), %v1737_v7  ;;  %s1740_s16 = smov (!%p403_p12), 48   ;;  %vm1072_vm3 = vcmask (!%p403_p12), 523264   ;;  %s1470_s12 = sshll.u32 (!%p403_p12), %s1423_s21, 8 }
  0x2c   : > { %1593 = vmatpush3.bf16.msra.mxu1 (!%p403_p12), %v1590_v13  ;;  %v1598_v53 = vpack.c.bf16 (!%p403_p12), %v1058_v51, %v1057_v50  ;;  %v1060_v54 = vld [vmem:[%s2020_s5 + $0x18] sm:$0xff] (!%p403_p12)  ;;  %v1442_v58 = vld [vmem:[%s2019_s4] ss:$0 sm:$0xff] (!%p403_p12)  ;;  %v758_v5 = vunpack.c.0.s8 (!%p403_p12), %v757_v62  ;;  %s1741_s21 = smov (!%p403_p12), [#allocation3]  }
  0x2d   : > { %1518 = vmatmul.mubr.msk.f32.vlgmr.msra.gmra.mrb[0].mxu0 (!%p403_p12), %vm467_vm0, %v451_v15  ;;  %1595 = vmatprep.subr.bf16.mxu1 (!%p403_p12), %v1594_v24  ;;  %v1602_v55 = vpack.c.bf16 (!%p403_p12), %v1060_v54, %v1059_v52  ;;  %v790_v23 = vunpack.c.0.s8 (!%p403_p12), %v789_v8  ;;  %s1676_s29 = sshll.u32 (!%p403_p12), %s1741_s21, 4  ;;  %s1677_s29 = int_to_ptr.vmem [resolvable:$false] %s1676_s29 }
  0x2e   : > { %1520 = vmatprep.mubr.msk.f32.mxu0 %vm467_vm0, %v452_v16  ;;  %1599 = vmatprep.subr.bf16.mxu0 %v1598_v53  ;;  %s1678_s0 = scalar_lea.vmem %s1677_s29, 512 }
  0x2f   : > { %1601 = vmatpush3.bf16.msra.mxu0 %v1598_v53 }
  0x30   : > { %1597 = vmatpush3.bf16.msra.mxu1 %v1594_v24  ;;  %1603 = vmatprep.subr.bf16.mxu0 %v1602_v55 }
  0x31   : > { %1521 = vmatmul.mubr.msk.f32.gmra.mrb[2].mxu0 %vm467_vm0, %v453_v17 }
  0x32   : > { %1523 = vmatprep.mubr.msk.f32.mxu0 %vm467_vm0, %v454_v18 }
  0x33   : > { %1605 = vmatpush3.bf16.msra.mxu0 %v1602_v55 }
  0x35   : > { %1524 = vmatmul.mubr.msk.f32.gmra.mrb[4].mxu0 %vm467_vm0, %v455_v19 }
  0x36   : > { %1526 = vmatprep.mubr.msk.f32.mxu0 %vm467_vm0, %v456_v20 }
  0x39   : > { %1527 = vmatmul.mubr.msk.f32.gmra.mrb[6].mxu0 %vm467_vm0, %v457_v21 }
 0x100   : > { %v1519_v26 = vpop.f32.mrb[0].mxu0 }
 0x101   : > { %v564_v27 = vadd.f32 %v1519_v26, %v1433_v25  ;;  %v558_v28 = vpop.f32.mrb[1].mxu0  ;;  %v761_v26 = vsub.s32 %v758_v5, %v760_v12 }
 0x102   : > { %v559_v29 = vadd.f32 %v1433_v25, %v558_v28 }
 0x103   : > { %v598_v32 = vmax.f32 %v564_v27, 0.0 }
 0x104   : > { %v597_v30 = vmax.f32 %v559_v29, 0.0  ;;  %v1522_v31 = vpop.f32.mrb[2].mxu0 }
 0x105   : > { %v574_v33 = vadd.f32 %v1522_v31, %v1433_v25  ;;  %v568_v34 = vpop.f32.mrb[3].mxu0 }
 0x106   : > { %v569_v35 = vadd.f32 %v1433_v25, %v568_v34  ;;  %1537 = vmatprep.mubr.msk.f32.mxu1 %vm616_vm1, %v597_v30 }
 0x107   : > { %1538 = vmatmul.mubr.msk.f32.vlgmr.msra.gmra.mrb[0].mxu1 %vm616_vm1, %v598_v32  ;;  %v600_v38 = vmax.f32 %v574_v33, 0.0  ;;  %v793_v32 = vsub.s32 %v790_v23, %v760_v12  ;;  %v1061_v23 = vld [vmem:[%s2020_s5 + $0x20] sm:$0xff] }
 0x108   : > { %v599_v36 = vmax.f32 %v569_v35, 0.0  ;;  %v1525_v37 = vpop.f32.mrb[4].mxu0 }
 0x109   : > { %v584_v39 = vadd.f32 %v1525_v37, %v1433_v25  ;;  %v578_v40 = vpop.f32.mrb[5].mxu0 }
 0x10a   : > { %v579_v41 = vadd.f32 %v1433_v25, %v578_v40  ;;  %1540 = vmatprep.mubr.msk.f32.mxu1 %vm616_vm1, %v599_v36 }
 0x10b   : > { %1541 = vmatmul.mubr.msk.f32.gmra.mrb[2].mxu1 %vm616_vm1, %v600_v38  ;;  %v602_v44 = vmax.f32 %v584_v39, 0.0 }
 0x10c   : > { %v601_v42 = vmax.f32 %v579_v41, 0.0  ;;  %v1528_v43 = vpop.f32.mrb[6].mxu0 }
 0x10d   : > { %v594_v45 = vadd.f32 %v1528_v43, %v1433_v25  ;;  %v588_v46 = vpop.f32.mrb[7].mxu0 }
 0x10e   : > { %v589_v47 = vadd.f32 %v1433_v25, %v588_v46  ;;  %1543 = vmatprep.mubr.msk.f32.mxu1 %vm616_vm1, %v601_v42 }
 0x10f   : > { %1544 = vmatmul.mubr.msk.f32.gmra.mrb[4].mxu1 %vm616_vm1, %v602_v44  ;;  %v604_v49 = vmax.f32 %v594_v45, 0.0 }
 0x110   : > { %v603_v48 = vmax.f32 %v589_v47, 0.0 }
 0x112   : > { %1546 = vmatprep.mubr.msk.f32.mxu1 %vm616_vm1, %v603_v48 }
 0x113   : > { %1547 = vmatmul.mubr.msk.f32.gmra.mrb[6].mxu1 %vm616_vm1, %v604_v49 }
 0x1da   : > { %v1539_v56 = vpop.f32.mrb[0].mxu1 }
 0x1db   : > { %v707_v57 = vpop.f32.mrb[1].mxu1  ;;  %v713_v63 = vadd.f32 %v1539_v56, %v1442_v58 }
 0x1dc   : > { %v708_v1 = vadd.f32 %v1442_v58, %v707_v57 }
 0x1dd   : > { %v747_v9 = vmax.f32 %v713_v63, 0.0 }
 0x1de   : > { %v1542_v59 = vpop.f32.mrb[2].mxu1  ;;  %v746_v13 = vmax.f32 %v708_v1, 0.0 }
 0x1df   : > { %v717_v60 = vpop.f32.mrb[3].mxu1  ;;  %v723_v10 = vadd.f32 %v1542_v59, %v1442_v58 }
 0x1e0   : > { %v718_v14 = vadd.f32 %v1442_v58, %v717_v60 }
 0x1e1   : > { %v749_v25 = vmax.f32 %v723_v10, 0.0 }
 0x1e2   : > { %v1545_v2 = vpop.f32.mrb[4].mxu1  ;;  %v748_v28 = vmax.f32 %v718_v14, 0.0 }
 0x1e3   : > { %v733_v3 = vadd.f32 %v1545_v2, %v1442_v58  ;;  %v727_v4 = vpop.f32.mrb[5].mxu1 }
 0x1e4   : > { %v728_v6 = vadd.f32 %v1442_v58, %v727_v4 }
 0x1e5   : > { %v751_v11 = vmax.f32 %v733_v3, 0.0 }
 0x1e6   : > { %v750_v15 = vmax.f32 %v728_v6, 0.0  ;;  %v1548_v16 = vpop.f32.mrb[6].mxu1 }
 0x1e7   : > { %v822_v17 = vcombine.low %v747_v9, %v751_v11  ;;  %v823_v18 = vcombine.high %v747_v9, %v751_v11  ;;  %v743_v19 = vadd.f32 %v1548_v16, %v1442_v58  ;;  %v737_v20 = vpop.f32.mrb[7].mxu1 }
 0x1e8   : > { %v754_v21 = vcombine.low %v746_v13, %v750_v15  ;;  %v755_v22 = vcombine.high %v746_v13, %v750_v15  ;;  %v738_v24 = vadd.f32 %v1442_v58, %v737_v20 }
 0x1e9   : > { %v753_v27 = vmax.f32 %v743_v19, 0.0  ;;  %v830_v35 = vrot.slane %v822_v17, %v761_v26  ;;  %v837_v36 = vrot.slane %v823_v18, %v761_v26 }
 0x1ea   : > { %v752_v29 = vmax.f32 %v738_v24, 0.0  ;;  %v762_v39 = vrot.slane %v754_v21, %v761_v26  ;;  %v769_v40 = vrot.slane %v755_v22, %v761_v26  ;;  %v1062_v24 = vld [vmem:[%s2020_s5 + $0x28] sm:$0xff] }
 0x1eb   : > { %v838_v30 = vcombine.low %v749_v25, %v753_v27  ;;  %v839_v31 = vcombine.high %v749_v25, %v753_v27 }
 0x1ec   : > { %v770_v33 = vcombine.low %v748_v28, %v752_v29  ;;  %v771_v34 = vcombine.high %v748_v28, %v752_v29  ;;  %v1063_v29 = vld [vmem:[%s2020_s5 + $0x30] sm:$0xff] }
 0x1ed   : > { %v846_v37 = vrot.slane %v838_v30, %v761_v26  ;;  %v853_v38 = vrot.slane %v839_v31, %v761_v26  ;;  %v1064_v30 = vld [vmem:[%s2020_s5 + $0x38] sm:$0xff] }
 0x1ee   : > { %v778_v41 = vrot.slane %v770_v33, %v761_v26  ;;  %v785_v42 = vrot.slane %v771_v34, %v761_v26 }
 0x1ef   : > { %v854_v43 = vcombine.low %v830_v35, %v846_v37  ;;  %v855_v44 = vcombine.high %v830_v35, %v846_v37  ;;  %v870_v45 = vcombine.low %v837_v36, %v853_v38  ;;  %v871_v46 = vcombine.high %v837_v36, %v853_v38  ;;  %v1156_v36 = vld [vmem:[%s2022_s7] sm:$0xff] }
 0x1f0   : > { %v786_v47 = vcombine.low %v762_v39, %v778_v41  ;;  %v787_v48 = vcombine.high %v762_v39, %v778_v41  ;;  %v802_v49 = vcombine.low %v769_v40, %v785_v42  ;;  %v803_v50 = vcombine.high %v769_v40, %v785_v42  ;;  %v1158_v41 = vld [vmem:[%s2022_s7 + $0x10] sm:$0xff]  ;;  %v1159_v42 = vld [vmem:[%s2022_s7 + $0x18] sm:$0xff] }
 0x1f1   : > { %v862_v51 = vrot.slane %v854_v43, %v793_v32  ;;  %v869_v52 = vrot.slane %v855_v44, %v793_v32  ;;  %v878_v53 = vrot.slane %v870_v45, %v793_v32  ;;  %v885_v54 = vrot.slane %v871_v46, %v793_v32 }
 0x1f2   : > { %v794_v55 = vrot.slane %v786_v47, %v793_v32  ;;  %v801_v56 = vrot.slane %v787_v48, %v793_v32  ;;  %v810_v57 = vrot.slane %v802_v49, %v793_v32  ;;  %v817_v58 = vrot.slane %v803_v50, %v793_v32 }
 0x1f3   : > { %v958_v59 = vcombine.low %v862_v51, %v869_v52  ;;  %v1453_v60 = vcombine.high %v862_v51, %v869_v52  ;;  %v974_v61 = vcombine.low %v878_v53, %v885_v54  ;;  %v1454_v62 = vcombine.high %v878_v53, %v885_v54 }
 0x1f4   : > { %v890_v63 = vcombine.low %v794_v55, %v801_v56  ;;  %v1451_v0 = vcombine.high %v794_v55, %v801_v56  ;;  %v906_v1 = vcombine.low %v810_v57, %v817_v58  ;;  %v1452_v2 = vcombine.high %v810_v57, %v817_v58 }
 0x1f5   : > { %v965_v3 = vrot.slane %v958_v59, %v761_v26  ;;  %v973_v4 = vrot.slane %v1453_v60, %v761_v26  ;;  %v981_v5 = vrot.slane %v974_v61, %v761_v26  ;;  %v989_v6 = vrot.slane %v1454_v62, %v761_v26  ;;  %v1455_v59 = vld [vmem:[%s2021_s6] ss:$0 sm:$0xff] }
 0x1f6   : > { %v897_v7 = vrot.slane %v890_v63, %v761_v26  ;;  %v905_v8 = vrot.slane %v1451_v0, %v761_v26  ;;  %v913_v9 = vrot.slane %v906_v1, %v761_v26  ;;  %v921_v10 = vrot.slane %v1452_v2, %v761_v26  ;;  %v1250_v2 = vld [vmem:[%s2024_s9] sm:$0xff] }
 0x1f7   : > { %v991_v11 = vcombine.high %v965_v3, %v973_v4  ;;  %v1007_v12 = vcombine.high %v981_v5, %v989_v6  ;;  %v990_v13 = vcombine.low %v965_v3, %v973_v4  ;;  %v1006_v14 = vcombine.low %v981_v5, %v989_v6  ;;  %v1251_v3 = vld [vmem:[%s2024_s9 + $0x8] sm:$0xff]  ;;  %v1458_v5 = vld [vmem:[%s2023_s8] ss:$0 sm:$0xff] }
 0x1f8   : > { %v923_v15 = vcombine.high %v897_v7, %v905_v8  ;;  %v939_v16 = vcombine.high %v913_v9, %v921_v10  ;;  %v922_v17 = vcombine.low %v897_v7, %v905_v8  ;;  %v938_v18 = vcombine.low %v913_v9, %v921_v10 }
 0x1f9   : > { %v1005_v19 = vrot.slane %v991_v11, %v793_v32  ;;  %v1021_v20 = vrot.slane %v1007_v12, %v793_v32  ;;  %v998_v21 = vrot.slane %v990_v13, %v793_v32  ;;  %v1014_v22 = vrot.slane %v1006_v14, %v793_v32  ;;  %v1461_v12 = vld [vmem:[%s2025_s10] ss:$0 sm:$0xff] }
 0x1fa   : > { %v937_v25 = vrot.slane %v923_v15, %v793_v32  ;;  %v953_v26 = vrot.slane %v939_v16, %v793_v32  ;;  %v930_v27 = vrot.slane %v922_v17, %v793_v32  ;;  %v946_v28 = vrot.slane %v938_v18, %v793_v32  ;;  %v1157_v32 = vld [vmem:[%s2022_s7 + $0x8] sm:$0xff] }
 0x1fb   : > { %v1024_v31 = vcombine.low %v1005_v19, %v1021_v20  ;;  %v1023_v33 = vcombine.high %v998_v21, %v1014_v22  ;;  %v1022_v34 = vcombine.low %v998_v21, %v1014_v22  ;;  %v1025_v35 = vcombine.high %v1005_v19, %v1021_v20 }
 0x1fc   : > { %v956_v37 = vcombine.low %v937_v25, %v953_v26  ;;  %v955_v38 = vcombine.high %v930_v27, %v946_v28  ;;  %v957_v39 = vcombine.high %v937_v25, %v953_v26  ;;  %v1606_v40 = vpack.c.bf16 %v1062_v24, %v1061_v23 }
 0x1fd   : > { %1038 = vrot.lane.b32.xlu1 %v1024_v31, %s1738_s14  ;;  %1030 = vrot.lane.b32.xlu0 %v1023_v33, %s1739_s15  ;;  %v954_v43 = vcombine.low %v930_v27, %v946_v28  ;;  %v1610_v44 = vpack.c.bf16 %v1064_v30, %v1063_v29  ;;  %v1614_v45 = vpack.c.bf16 %v1157_v32, %v1156_v36 }
 0x1fe   : > { %1607 = vmatprep.subr.bf16.mxu0 %v1606_v40  ;;  %v1618_v46 = vpack.c.bf16 %v1159_v42, %v1158_v41  ;;  %v1622_v4 = vpack.c.bf16 %v1251_v3, %v1250_v2 }
 0x1ff   : > { %1609 = vmatpush3.bf16.msra.mxu0 %v1606_v40  ;;  %1615 = vmatprep.subr.bf16.mxu1 %v1614_v45 }
 0x200   : > { %1611 = vmatprep.subr.bf16.mxu0 %v1610_v44  ;;  %1617 = vmatpush3.bf16.msra.mxu1 %v1614_v45 }
 0x201   : > { %1036 = vrot.lane.b32.xlu1 %v956_v37, %s1738_s14  ;;  %1028 = vrot.lane.b32.xlu0 %v955_v38, %s1739_s15  ;;  %s1971_s15 = scalar_lea.hbm %s2026_s11, %s1470_s12 }
 0x202   : > { %1619 = vmatprep.subr.bf16.mxu1 %v1618_v46 }
 0x203   : > { %1613 = vmatpush3.bf16.msra.mxu0 %v1610_v44 }
 0x204   : > { %1621 = vmatpush3.bf16.msra.mxu1 %v1618_v46  ;;  %1623 = vmatprep.subr.bf16.mxu0 %v1622_v4 }
 0x205   : > { %1046 = vrot.lane.b32.xlu1 %v1025_v35, %s1740_s16  ;;  %1044 = vrot.lane.b32.xlu0 %v957_v39, %s1740_s16  ;;  %s1432_s16 = sshll.u32 %s1867_s30, 4 }
 0x206   : > { %s447_s22 = scalar_lea.vmem [#allocation3], %s1432_s16  ;;  %s1343_s16 = scalar_lea.sflag [#allocation4], %s1867_s30 }
 0x207   : > { %s1356_s24 = sshll.u32 %s447_s22, 4  ;;  %s1966_s24 = int_to_ptr.vmem [resolvable:$true] %s1356_s24 }
 0x208   : > { %s1672_s25 = scalar_lea.vmem %s1966_s24, 256  ;;  %p1679_p2 = scmp.lt.s32.totalorder %s1966_s24, %s1677_s29 }
 0x209   : > { %p1673_p13 = scmp.ne.s32.totalorder %s1966_s24, %s1672_s25  ;;  %p1680_p3 = scmp.lt.s32.totalorder %s1678_s0, %s1672_s25 }
 0x20b   : > { %p1674_p0 = pnand %p1673_p13, %p1842_p6  ;;  %p1681_p4 = por %p1680_p3, %p1679_p2 }
 0x20d   : > { %p1675_p1 = pneg %p1674_p0 }
 0x20f   : > { %p1682_p5 = pnand %p1681_p4, %p1675_p1 }
 0x26f   : > { %v1039_v47 = vpop.permute.xlu1 %1038  ;;  %v1031_v48 = vpop.permute.xlu0 %1030 }
 0x270   : > { %v1051_v51 = vsel %vm467_vm0, %v1022_v34, %v1031_v48 }
 0x271   : > { %v1053_v53 = vsel %vm616_vm1, %v1051_v51, %v1039_v47 }
 0x273   : > { %v1037_v49 = vpop.permute.xlu1 %1036  ;;  %v1029_v50 = vpop.permute.xlu0 %1028 }
 0x274   : > { %v1050_v52 = vsel %vm467_vm0, %v954_v43, %v1029_v50 }
 0x275   : > { %v1052_v56 = vsel %vm616_vm1, %v1050_v52, %v1037_v49 }
 0x277   : > { %v1047_v54 = vpop.permute.xlu1 %1046  ;;  %v1045_v55 = vpop.permute.xlu0 %1044 }
 0x278   : > { %v1056_v57 = vsel %vm1054_vm2, %v1053_v53, %v1047_v54  ;;  %v1055_v58 = vsel %vm1054_vm2, %v1052_v56, %v1045_v55 }
 0x279   : > { %1565 = vmatprep.mubr.msk.f32.mxu0 %vm1072_vm3, %v1055_v58 }
 0x27a   : > { %1566 = vmatmul.mubr.msk.f32.vlgmr.msra.gmra.mrb[8].mxu0 %vm1072_vm3, %v1056_v57 }
 0x27b   : > { %1625 = vmatpush3.bf16.msra.mxu0 %v1622_v4 }
 0x34d   : > { %v1567_v60 = vpop.f32.mrb[8].mxu0 }
 0x34e   : > { %v1151_v61 = vadd.f32 %v1567_v60, %v1455_v59  ;;  %v1145_v62 = vpop.f32.mrb[9].mxu0 }
 0x34f   : > { %v1146_v63 = vadd.f32 %v1455_v59, %v1145_v62 }
 0x350   : > { %v1155_v1 = vmax.f32 %v1151_v61, 0.0 }
 0x351   : > { %v1154_v0 = vmax.f32 %v1146_v63, 0.0 }
 0x353   : > { %1576 = vmatprep.mubr.msk.f32.mxu1 %vm616_vm1, %v1154_v0 }
 0x354   : > { %1577 = vmatmul.mubr.msk.f32.vlgmr.msra.gmra.mrb[8].mxu1 %vm616_vm1, %v1155_v1 }
 0x427   : > { %v1578_v6 = vpop.f32.mrb[8].mxu1 }
 0x428   : > { %v1245_v7 = vadd.f32 %v1578_v6, %v1458_v5  ;;  %v1239_v8 = vpop.f32.mrb[9].mxu1 }
 0x429   : > { %v1240_v9 = vadd.f32 %v1458_v5, %v1239_v8 }
 0x42a   : > { %v1249_v11 = vmax.f32 %v1245_v7, 0.0 }
 0x42b   : > { %v1248_v10 = vmax.f32 %v1240_v9, 0.0 }
 0x42d   : > { %1583 = vmatprep.mubr.msk.f32.mxu0 %vm467_vm0, %v1248_v10 }
 0x42e   : > { %1584 = vmatmul.mubr.msk.f32.vlgmr.msra.gmra.mrb[10].mxu0 %vm467_vm0, %v1249_v11 }
 0x501   : > { %v1585_v13 = vpop.f32.mrb[10].mxu0 }
 0x502   : > { %v1337_v14 = vadd.f32 %v1585_v13, %v1461_v12  ;;  %v1331_v15 = vpop.f32.mrb[11].mxu0 }
 0x503   : > { %v1332_v16 = vadd.f32 %v1461_v12, %v1331_v15 }
 0x504   : > { %1341 = vst [vmem:[%s447_s22 + $0x8] sm:$0xff] %v1337_v14 }
 0x505   : > { %1340 = vst [vmem:[%s447_s22] sm:$0xff] %v1332_v16 }
 0x506   : > { %1685 = shalt.err (!%p1682_p5)
}
 0x507   : > { %s1686_s22 = scalar_lea.hbm %s1971_s15, 256  ;;  %s1690_s14 = scalar_lea.hbm %s2026_s11, 512 }
 0x508   : > { %p1687_p7 = scmp.ne.s32.totalorder %s1971_s15, %s1686_s22  ;;  %p1691_p12 = scmp.lt.u32.totalorder %s1971_s15, %s2026_s11 }
 0x509   : > { %p1692_p13 = scmp.lt.u32.totalorder %s1690_s14, %s1686_s22  ;;  %p1694_p1 = scmp.lt.u32.totalorder %s1686_s22, %s1971_s15 }
 0x50a   : > { %p1688_p10 = pnand %p1687_p7, %p1842_p6 }
 0x50b   : > { %p1693_p0 = por %p1692_p13, %p1691_p12 }
 0x50c   : > { %p1689_p11 = pneg %p1688_p10 }
 0x50d   : > { %p1695_p2 = por %p1694_p1, %p1693_p0 }
 0x50f   : > { %p1696_p3 = pnand %p1695_p2, %p1689_p11 }
 0x511   : > { %1699 = shalt.err (!%p1696_p3)
}
 0x512   : > { %s1742_s0 = smov 128   ;;  %s1743_s25 = smov 8  }
 0x513   : > { %1626 = dma.vmem_to_hbm [thread:$0]  (%p1842_p6), %s1966_s24, 256, %s1971_s15, %s1343_s16, %s1742_s0, %s1742_s0, %s1743_s25  }
 0x514 PF: > { %s1371_s12 = sand.u32 1, %s1722_s17   ;;  %p1629_p4 = pnand %p1426_p9, %p1846_p8 }
 0x515   : > { %s1372_s22 = scalar_lea.sflag [#allocation4], %s1371_s12 }
 0x516   : > { %1717 = dma.done.wait (!%p1629_p4), %s1372_s22, 256  }
 0x517   : > { %1719 = vsyncadd (!%p1629_p4), %s1372_s22, 4294967040  ;;  %p21_p5 = scmp.ge.s32.totalorder %s1827_s23, 4   ;;  %s2031_s17 = smov %s1726_s18 }
 0x518   : > { %s2032_s18 = smov %s1730_s19  ;;  %s2033_s19 = smov %s1840_s26 }
 0x519   : > { %s2034_s20 = smov %s1827_s23  ;;  %23 = sbr.rel (!%p21_p5) target bundleno = 5 (0x5), region = 142 }
 0x520   :  { %1377 = vsyncpa [#allocation4], 1 }
 0x521   :  { %1379 = vsyncpa [#allocation4 + $0x1], 1 }

</bundles_post_ra>
